<compile_context>
chip_gen: v6e
topology: v6e:2x2x1
jax: 0.10.0
libtpu: 0.0.40
codegen_flags: <defaults>
</compile_context>

<pallas_src>
import jax
import jax.numpy as jnp
from jax.experimental import pallas as pl
from jax.experimental.pallas import tpu as pltpu

INPUT_SIZE = 10
HIDDEN_SIZE = 20
FC_OUT = 5
FC2_OUT = 1
SEQ_LEN = 8
LANE_PAD = 128  # lane-dense output / slab width

# ---- parameter-slab row offsets (all starts 8-aligned for clean sublane views)
WIHT_R = 0      # W_ih^T          (10, 20)
WIH_R = 16      # W_ih            (20, 10)
WHHT_R = 40     # W_hh^T          (20, 20)   row-path weight
WHH_R = 64      # W_hh            (20, 20)   column-path weight
BROW_R = 88     # b_ih + b_hh     (1, 20)    row layout
BCOL_R = 96     # b_ih + b_hh     (20, 1)    column layout
WHEAD_R = 120   # W_fc^T @ W_fc2^T, zero-padded to (20, 128)
BHEAD_R = 144   # b_fc @ W_fc2^T + b_fc2, zero-padded to (1, 128)
PARAM_ROWS = 152

# ---- input-slab row offsets
X_R = 0         # x               (8, 10)
XT_R = 8        # x^T             (10, 8)
H0ROW_R = 24    # h0              (1, 20)
H0COL_R = 32    # h0^T            (20, 1)
INPUT_ROWS = 56


def rnn_kernel(inp_ref, par_ref, out_ref):
    f32 = jnp.float32
    pdef = jax.lax.Precision.DEFAULT  # pin: keep single-pass MXU lowering

    # ---- carve operands out of the two VMEM slabs (static views) ----------
    x = inp_ref[X_R:X_R + SEQ_LEN, :INPUT_SIZE]                     # (8, 10)
    x_t = inp_ref[XT_R:XT_R + INPUT_SIZE, :SEQ_LEN]                 # (10, 8)
    h_row = inp_ref[H0ROW_R:H0ROW_R + 1, :HIDDEN_SIZE]              # (1, 20)
    h_col = inp_ref[H0COL_R:H0COL_R + HIDDEN_SIZE, 0:1]             # (20, 1)

    wih_t = par_ref[WIHT_R:WIHT_R + INPUT_SIZE, :HIDDEN_SIZE]       # (10, 20)
    wih = par_ref[WIH_R:WIH_R + HIDDEN_SIZE, :INPUT_SIZE]           # (20, 10)
    whh_t = par_ref[WHHT_R:WHHT_R + HIDDEN_SIZE, :HIDDEN_SIZE]      # (20, 20)
    whh = par_ref[WHH_R:WHH_R + HIDDEN_SIZE, :HIDDEN_SIZE]          # (20, 20)
    b_row = par_ref[BROW_R:BROW_R + 1, :HIDDEN_SIZE]                # (1, 20)
    b_col = par_ref[BCOL_R:BCOL_R + HIDDEN_SIZE, 0:1]               # (20, 1)
    w_head = par_ref[WHEAD_R:WHEAD_R + HIDDEN_SIZE, :]              # (20, 128)
    b_head = par_ref[BHEAD_R:BHEAD_R + 1, :]                        # (1, 128)

    # ---- one-shot input projections for every timestep (MXU, outside the
    #      serial chain), in both row (seq,hidden) and column (hidden,seq)
    #      layouts; RNN biases pre-folded into b_row / b_col. ----------------
    xw_row = jnp.dot(x, wih_t, preferred_element_type=f32,
                     precision=pdef) + b_row                        # (8, 20)
    xw_col = jnp.dot(wih, x_t, preferred_element_type=f32,
                     precision=pdef) + b_col                        # (20, 8)

    # ---- 8-step serial recurrence, entirely on VPU + XLU ------------------
    # The hidden state is carried redundantly as a row (1,20) and a column
    # (20,1).  Each step:
    #   row  update: sum over sublanes of  Whh^T ⊙ h_col   -> (1, 20)
    #   col  update: sum over lanes    of  Whh   ⊙ h_row   -> (20, 1)
    # Both equal Whh @ h, so no transpose is ever needed on the chain.
    hs = []
    for t in range(SEQ_LEN):
        pre_row = xw_row[t:t + 1, :] + jnp.sum(whh_t * h_col, axis=0,
                                               keepdims=True)
        pre_col = xw_col[:, t:t + 1] + jnp.sum(whh * h_row, axis=1,
                                               keepdims=True)
        h_row = jnp.maximum(pre_row, 0.0)
        h_col = jnp.maximum(pre_col, 0.0)
        hs.append(h_row)
    hseq = jnp.concatenate(hs, axis=0)                              # (8, 20)

    # ---- fused fc∘fc2 head, lane-padded to 128 -> one dense (8,128) store
    out_ref[...] = (jnp.dot(hseq, w_head, preferred_element_type=f32,
                            precision=pdef) + b_head)


def build_input_slab(x, h0):
    """Pack the runtime inputs (x, x^T, h0 row, h0 column) into one
    zero-padded, tile-aligned f32 slab -> a single dense DMA."""
    slab = jnp.zeros((INPUT_ROWS, LANE_PAD), jnp.float32)
    slab = slab.at[X_R:X_R + SEQ_LEN, :INPUT_SIZE].set(x)
    slab = slab.at[XT_R:XT_R + INPUT_SIZE, :SEQ_LEN].set(x.T)
    slab = slab.at[H0ROW_R, :HIDDEN_SIZE].set(h0[0])
    slab = slab.at[H0COL_R:H0COL_R + HIDDEN_SIZE, 0].set(h0[0])
    return slab


def rnn_forward(x, h0, param_slab):
    inp_slab = build_input_slab(x, h0)
    vmem = pl.BlockSpec(memory_space=pltpu.MemorySpace.VMEM)
    out_padded = pl.pallas_call(
        rnn_kernel,
        out_shape=jax.ShapeDtypeStruct((SEQ_LEN, LANE_PAD), jnp.float32),
        in_specs=[vmem, vmem],
        out_specs=vmem,
    )(inp_slab, param_slab)
    # Column 0 is the real (seq, 1) output; the rest is zero lane padding.
    return out_padded[:, :FC2_OUT]


def init_params(key):
    """Deterministic init mirroring PyTorch default uniform ranges, plus the
    host-side (exact) weight folds, packed into a single parameter slab."""
    ks = jax.random.split(key, 8)

    def u(k, shape, fan_in):
        bound = 1.0 / jnp.sqrt(float(fan_in))
        return jax.random.uniform(k, shape, jnp.float32, -bound, bound)

    # nn.RNN(10, 20): W_ih (20,10), W_hh (20,20), biases (20,)
    w_ih = u(ks[0], (HIDDEN_SIZE, INPUT_SIZE), HIDDEN_SIZE)
    w_hh = u(ks[1], (HIDDEN_SIZE, HIDDEN_SIZE), HIDDEN_SIZE)
    b_ih = u(ks[2], (1, HIDDEN_SIZE), HIDDEN_SIZE)
    b_hh = u(ks[3], (1, HIDDEN_SIZE), HIDDEN_SIZE)
    # fc: Linear(20, 5), fc2: Linear(5, 1)
    w_fc = u(ks[4], (FC_OUT, HIDDEN_SIZE), HIDDEN_SIZE)
    b_fc = u(ks[5], (1, FC_OUT), HIDDEN_SIZE)
    w_fc2 = u(ks[6], (FC2_OUT, FC_OUT), FC_OUT)
    b_fc2 = u(ks[7], (1, FC2_OUT), FC_OUT)

    # Exact host-side folds (once, off the hot path).
    b_rnn = b_ih + b_hh                               # (1, 20)
    w_head = w_fc.T @ w_fc2.T                         # (20, 1)  fc∘fc2 weight
    b_head = b_fc @ w_fc2.T + b_fc2                   # (1, 1)   fc∘fc2 bias

    slab = jnp.zeros((PARAM_ROWS, LANE_PAD), jnp.float32)
    slab = slab.at[WIHT_R:WIHT_R + INPUT_SIZE, :HIDDEN_SIZE].set(w_ih.T)
    slab = slab.at[WIH_R:WIH_R + HIDDEN_SIZE, :INPUT_SIZE].set(w_ih)
    slab = slab.at[WHHT_R:WHHT_R + HIDDEN_SIZE, :HIDDEN_SIZE].set(w_hh.T)
    slab = slab.at[WHH_R:WHH_R + HIDDEN_SIZE, :HIDDEN_SIZE].set(w_hh)
    slab = slab.at[BROW_R, :HIDDEN_SIZE].set(b_rnn[0])
    slab = slab.at[BCOL_R:BCOL_R + HIDDEN_SIZE, 0].set(b_rnn[0])
    slab = slab.at[WHEAD_R:WHEAD_R + HIDDEN_SIZE, :FC2_OUT].set(w_head)
    slab = slab.at[BHEAD_R, :FC2_OUT].set(b_head[0])

    raw = {"w_ih": w_ih, "w_hh": w_hh, "b_ih": b_ih, "b_hh": b_hh,
           "w_fc": w_fc, "b_fc": b_fc, "w_fc2": w_fc2, "b_fc2": b_fc2}
    return slab, raw


def reference_forward(x, h0, raw):
    """Pure-JAX mirror of the PyTorch forward (unfused fc/fc2, separate
    biases), pinned to HIGHEST precision so it is an exact-f32 reference."""
    hp = jax.lax.Precision.HIGHEST
    h = h0
    hs = []
    for t in range(x.shape[0]):
        h = jnp.maximum(
            jnp.dot(x[t:t + 1, :], raw["w_ih"].T, precision=hp) + raw["b_ih"]
            + jnp.dot(h, raw["w_hh"].T, precision=hp) + raw["b_hh"], 0.0)
        hs.append(h)
    out = jnp.concatenate(hs, axis=0)                 # (seq, hidden)
    out = out.reshape(out.shape[0], -1)               # no-op (unbatched input)
    out = jnp.dot(out, raw["w_fc"].T, precision=hp) + raw["b_fc"]
    out = jnp.dot(out, raw["w_fc2"].T, precision=hp) + raw["b_fc2"]
    return out


if __name__ == "__main__":
    key = jax.random.PRNGKey(0)
    k_param, k_x, k_h0 = jax.random.split(key, 3)

    param_slab, raw = init_params(k_param)
    x = jax.random.normal(k_x, (SEQ_LEN, INPUT_SIZE), jnp.float32)
    # torch.rand(1, 20) in forward() -> deterministic uniform[0,1) h0 here.
    h0 = jax.random.uniform(k_h0, (1, HIDDEN_SIZE), jnp.float32)

    fwd = jax.jit(rnn_forward)
    out = jax.block_until_ready(fwd(x, h0, param_slab))

    ref = reference_forward(x, h0, raw)
    assert out.shape == (SEQ_LEN, FC2_OUT)
    # Tolerance accounts for the kernel's MXU dots running at DEFAULT
    # (possibly bf16-pass) precision vs. the exact-f32 reference; structural
    # bugs would show up as O(0.1+) errors, far above this.
    assert jnp.allclose(out, ref, atol=5e-3, rtol=5e-3)

    print("KERNEL_OK")
</pallas_src>

<mosaic_0001>
module attributes {stable_mosaic.version = 11 : i64} {
  func.func @rnn_kernel(%arg0: memref<56x128xf32, #tpu.memory_space<vmem>>, %arg1: memref<152x128xf32, #tpu.memory_space<vmem>>, %arg2: memref<8x128xf32, #tpu.memory_space<vmem>>) attributes {dimension_semantics = [], scalar_prefetch = 0 : i64, scratch_operands = 0 : i64, tpu.core_type = #tpu.core_type<tc>} {
    %c0 = arith.constant 0 : index
    %c0_0 = arith.constant 0 : index
    %0 = vector.load %arg0[%c0, %c0_0] : memref<56x128xf32, #tpu.memory_space<vmem>>, vector<8x10xf32>
    %c8 = arith.constant 8 : index
    %c0_1 = arith.constant 0 : index
    %1 = vector.load %arg0[%c8, %c0_1] : memref<56x128xf32, #tpu.memory_space<vmem>>, vector<10x8xf32>
    %c24 = arith.constant 24 : index
    %c0_2 = arith.constant 0 : index
    %2 = vector.load %arg0[%c24, %c0_2] : memref<56x128xf32, #tpu.memory_space<vmem>>, vector<1x20xf32>
    %c32 = arith.constant 32 : index
    %c0_3 = arith.constant 0 : index
    %3 = vector.load %arg0[%c32, %c0_3] : memref<56x128xf32, #tpu.memory_space<vmem>>, vector<20x1xf32>
    %c0_4 = arith.constant 0 : index
    %c0_5 = arith.constant 0 : index
    %4 = vector.load %arg1[%c0_4, %c0_5] : memref<152x128xf32, #tpu.memory_space<vmem>>, vector<10x20xf32>
    %c16 = arith.constant 16 : index
    %c0_6 = arith.constant 0 : index
    %5 = vector.load %arg1[%c16, %c0_6] : memref<152x128xf32, #tpu.memory_space<vmem>>, vector<20x10xf32>
    %c40 = arith.constant 40 : index
    %c0_7 = arith.constant 0 : index
    %6 = vector.load %arg1[%c40, %c0_7] : memref<152x128xf32, #tpu.memory_space<vmem>>, vector<20x20xf32>
    %c64 = arith.constant 64 : index
    %c0_8 = arith.constant 0 : index
    %7 = vector.load %arg1[%c64, %c0_8] : memref<152x128xf32, #tpu.memory_space<vmem>>, vector<20x20xf32>
    %c88 = arith.constant 88 : index
    %c0_9 = arith.constant 0 : index
    %8 = vector.load %arg1[%c88, %c0_9] : memref<152x128xf32, #tpu.memory_space<vmem>>, vector<1x20xf32>
    %c96 = arith.constant 96 : index
    %c0_10 = arith.constant 0 : index
    %9 = vector.load %arg1[%c96, %c0_10] : memref<152x128xf32, #tpu.memory_space<vmem>>, vector<20x1xf32>
    %c120 = arith.constant 120 : index
    %c0_11 = arith.constant 0 : index
    %10 = vector.load %arg1[%c120, %c0_11] : memref<152x128xf32, #tpu.memory_space<vmem>>, vector<20x128xf32>
    %c144 = arith.constant 144 : index
    %c0_12 = arith.constant 0 : index
    %11 = vector.load %arg1[%c144, %c0_12] : memref<152x128xf32, #tpu.memory_space<vmem>>, vector<1x128xf32>
    %cst = arith.constant dense<0.000000e+00> : vector<8x20xf32>
    %12 = tpu.matmul %0, %4, %cst {dimension_numbers = #tpu.dot_dimension_numbers<[1], [0], [0], [1], [0, 0, 1, 1], [], []>} : vector<8x10xf32>, vector<10x20xf32>, vector<8x20xf32> -> vector<8x20xf32>
    %13 = vector.broadcast %8 : vector<1x20xf32> to vector<8x20xf32>
    %14 = arith.addf %12, %13 : vector<8x20xf32>
    %cst_13 = arith.constant dense<0.000000e+00> : vector<20x8xf32>
    %15 = tpu.matmul %5, %1, %cst_13 {dimension_numbers = #tpu.dot_dimension_numbers<[1], [0], [0], [1], [0, 0, 1, 1], [], []>} : vector<20x10xf32>, vector<10x8xf32>, vector<20x8xf32> -> vector<20x8xf32>
    %16 = vector.broadcast %9 : vector<20x1xf32> to vector<20x8xf32>
    %17 = arith.addf %15, %16 : vector<20x8xf32>
    %18 = vector.extract_strided_slice %14 {offsets = [0, 0], sizes = [1, 20], strides = [1, 1]} : vector<8x20xf32> to vector<1x20xf32>
    %19 = vector.broadcast %3 : vector<20x1xf32> to vector<20x20xf32>
    %20 = arith.mulf %6, %19 : vector<20x20xf32>
    %cst_14 = arith.constant dense<0.000000e+00> : vector<20xf32>
    %21 = vector.multi_reduction <add>, %20, %cst_14 [0] : vector<20x20xf32> to vector<20xf32>
    %22 = vector.shape_cast %21 : vector<20xf32> to vector<1x20xf32>
    %23 = arith.addf %18, %22 : vector<1x20xf32>
    %24 = vector.extract_strided_slice %17 {offsets = [0, 0], sizes = [20, 1], strides = [1, 1]} : vector<20x8xf32> to vector<20x1xf32>
    %25 = vector.broadcast %2 : vector<1x20xf32> to vector<20x20xf32>
    %26 = arith.mulf %7, %25 : vector<20x20xf32>
    %cst_15 = arith.constant dense<0.000000e+00> : vector<20xf32>
    %27 = vector.multi_reduction <add>, %26, %cst_15 [1] : vector<20x20xf32> to vector<20xf32>
    %28 = vector.shape_cast %27 : vector<20xf32> to vector<20x1xf32>
    %29 = arith.addf %24, %28 : vector<20x1xf32>
    %cst_16 = arith.constant 0.000000e+00 : f32
    %30 = vector.broadcast %cst_16 : f32 to vector<1x20xf32>
    %31 = arith.maximumf %23, %30 : vector<1x20xf32>
    %cst_17 = arith.constant 0.000000e+00 : f32
    %32 = vector.broadcast %cst_17 : f32 to vector<20x1xf32>
    %33 = arith.maximumf %29, %32 : vector<20x1xf32>
    %34 = vector.extract_strided_slice %14 {offsets = [1, 0], sizes = [1, 20], strides = [1, 1]} : vector<8x20xf32> to vector<1x20xf32>
    %35 = vector.broadcast %33 : vector<20x1xf32> to vector<20x20xf32>
    %36 = arith.mulf %6, %35 : vector<20x20xf32>
    %cst_18 = arith.constant dense<0.000000e+00> : vector<20xf32>
    %37 = vector.multi_reduction <add>, %36, %cst_18 [0] : vector<20x20xf32> to vector<20xf32>
    %38 = vector.shape_cast %37 : vector<20xf32> to vector<1x20xf32>
    %39 = arith.addf %34, %38 : vector<1x20xf32>
    %40 = vector.extract_strided_slice %17 {offsets = [0, 1], sizes = [20, 1], strides = [1, 1]} : vector<20x8xf32> to vector<20x1xf32>
    %41 = vector.broadcast %31 : vector<1x20xf32> to vector<20x20xf32>
    %42 = arith.mulf %7, %41 : vector<20x20xf32>
    %cst_19 = arith.constant dense<0.000000e+00> : vector<20xf32>
    %43 = vector.multi_reduction <add>, %42, %cst_19 [1] : vector<20x20xf32> to vector<20xf32>
    %44 = vector.shape_cast %43 : vector<20xf32> to vector<20x1xf32>
    %45 = arith.addf %40, %44 : vector<20x1xf32>
    %cst_20 = arith.constant 0.000000e+00 : f32
    %46 = vector.broadcast %cst_20 : f32 to vector<1x20xf32>
    %47 = arith.maximumf %39, %46 : vector<1x20xf32>
    %cst_21 = arith.constant 0.000000e+00 : f32
    %48 = vector.broadcast %cst_21 : f32 to vector<20x1xf32>
    %49 = arith.maximumf %45, %48 : vector<20x1xf32>
    %50 = vector.extract_strided_slice %14 {offsets = [2, 0], sizes = [1, 20], strides = [1, 1]} : vector<8x20xf32> to vector<1x20xf32>
    %51 = vector.broadcast %49 : vector<20x1xf32> to vector<20x20xf32>
    %52 = arith.mulf %6, %51 : vector<20x20xf32>
    %cst_22 = arith.constant dense<0.000000e+00> : vector<20xf32>
    %53 = vector.multi_reduction <add>, %52, %cst_22 [0] : vector<20x20xf32> to vector<20xf32>
    %54 = vector.shape_cast %53 : vector<20xf32> to vector<1x20xf32>
    %55 = arith.addf %50, %54 : vector<1x20xf32>
    %56 = vector.extract_strided_slice %17 {offsets = [0, 2], sizes = [20, 1], strides = [1, 1]} : vector<20x8xf32> to vector<20x1xf32>
    %57 = vector.broadcast %47 : vector<1x20xf32> to vector<20x20xf32>
    %58 = arith.mulf %7, %57 : vector<20x20xf32>
    %cst_23 = arith.constant dense<0.000000e+00> : vector<20xf32>
    %59 = vector.multi_reduction <add>, %58, %cst_23 [1] : vector<20x20xf32> to vector<20xf32>
    %60 = vector.shape_cast %59 : vector<20xf32> to vector<20x1xf32>
    %61 = arith.addf %56, %60 : vector<20x1xf32>
    %cst_24 = arith.constant 0.000000e+00 : f32
    %62 = vector.broadcast %cst_24 : f32 to vector<1x20xf32>
    %63 = arith.maximumf %55, %62 : vector<1x20xf32>
    %cst_25 = arith.constant 0.000000e+00 : f32
    %64 = vector.broadcast %cst_25 : f32 to vector<20x1xf32>
    %65 = arith.maximumf %61, %64 : vector<20x1xf32>
    %66 = vector.extract_strided_slice %14 {offsets = [3, 0], sizes = [1, 20], strides = [1, 1]} : vector<8x20xf32> to vector<1x20xf32>
    %67 = vector.broadcast %65 : vector<20x1xf32> to vector<20x20xf32>
    %68 = arith.mulf %6, %67 : vector<20x20xf32>
    %cst_26 = arith.constant dense<0.000000e+00> : vector<20xf32>
    %69 = vector.multi_reduction <add>, %68, %cst_26 [0] : vector<20x20xf32> to vector<20xf32>
    %70 = vector.shape_cast %69 : vector<20xf32> to vector<1x20xf32>
    %71 = arith.addf %66, %70 : vector<1x20xf32>
    %72 = vector.extract_strided_slice %17 {offsets = [0, 3], sizes = [20, 1], strides = [1, 1]} : vector<20x8xf32> to vector<20x1xf32>
    %73 = vector.broadcast %63 : vector<1x20xf32> to vector<20x20xf32>
    %74 = arith.mulf %7, %73 : vector<20x20xf32>
    %cst_27 = arith.constant dense<0.000000e+00> : vector<20xf32>
    %75 = vector.multi_reduction <add>, %74, %cst_27 [1] : vector<20x20xf32> to vector<20xf32>
    %76 = vector.shape_cast %75 : vector<20xf32> to vector<20x1xf32>
    %77 = arith.addf %72, %76 : vector<20x1xf32>
    %cst_28 = arith.constant 0.000000e+00 : f32
    %78 = vector.broadcast %cst_28 : f32 to vector<1x20xf32>
    %79 = arith.maximumf %71, %78 : vector<1x20xf32>
    %cst_29 = arith.constant 0.000000e+00 : f32
    %80 = vector.broadcast %cst_29 : f32 to vector<20x1xf32>
    %81 = arith.maximumf %77, %80 : vector<20x1xf32>
    %82 = vector.extract_strided_slice %14 {offsets = [4, 0], sizes = [1, 20], strides = [1, 1]} : vector<8x20xf32> to vector<1x20xf32>
    %83 = vector.broadcast %81 : vector<20x1xf32> to vector<20x20xf32>
    %84 = arith.mulf %6, %83 : vector<20x20xf32>
    %cst_30 = arith.constant dense<0.000000e+00> : vector<20xf32>
    %85 = vector.multi_reduction <add>, %84, %cst_30 [0] : vector<20x20xf32> to vector<20xf32>
    %86 = vector.shape_cast %85 : vector<20xf32> to vector<1x20xf32>
    %87 = arith.addf %82, %86 : vector<1x20xf32>
    %88 = vector.extract_strided_slice %17 {offsets = [0, 4], sizes = [20, 1], strides = [1, 1]} : vector<20x8xf32> to vector<20x1xf32>
    %89 = vector.broadcast %79 : vector<1x20xf32> to vector<20x20xf32>
    %90 = arith.mulf %7, %89 : vector<20x20xf32>
    %cst_31 = arith.constant dense<0.000000e+00> : vector<20xf32>
    %91 = vector.multi_reduction <add>, %90, %cst_31 [1] : vector<20x20xf32> to vector<20xf32>
    %92 = vector.shape_cast %91 : vector<20xf32> to vector<20x1xf32>
    %93 = arith.addf %88, %92 : vector<20x1xf32>
    %cst_32 = arith.constant 0.000000e+00 : f32
    %94 = vector.broadcast %cst_32 : f32 to vector<1x20xf32>
    %95 = arith.maximumf %87, %94 : vector<1x20xf32>
    %cst_33 = arith.constant 0.000000e+00 : f32
    %96 = vector.broadcast %cst_33 : f32 to vector<20x1xf32>
    %97 = arith.maximumf %93, %96 : vector<20x1xf32>
    %98 = vector.extract_strided_slice %14 {offsets = [5, 0], sizes = [1, 20], strides = [1, 1]} : vector<8x20xf32> to vector<1x20xf32>
    %99 = vector.broadcast %97 : vector<20x1xf32> to vector<20x20xf32>
    %100 = arith.mulf %6, %99 : vector<20x20xf32>
    %cst_34 = arith.constant dense<0.000000e+00> : vector<20xf32>
    %101 = vector.multi_reduction <add>, %100, %cst_34 [0] : vector<20x20xf32> to vector<20xf32>
    %102 = vector.shape_cast %101 : vector<20xf32> to vector<1x20xf32>
    %103 = arith.addf %98, %102 : vector<1x20xf32>
    %104 = vector.extract_strided_slice %17 {offsets = [0, 5], sizes = [20, 1], strides = [1, 1]} : vector<20x8xf32> to vector<20x1xf32>
    %105 = vector.broadcast %95 : vector<1x20xf32> to vector<20x20xf32>
    %106 = arith.mulf %7, %105 : vector<20x20xf32>
    %cst_35 = arith.constant dense<0.000000e+00> : vector<20xf32>
    %107 = vector.multi_reduction <add>, %106, %cst_35 [1] : vector<20x20xf32> to vector<20xf32>
    %108 = vector.shape_cast %107 : vector<20xf32> to vector<20x1xf32>
    %109 = arith.addf %104, %108 : vector<20x1xf32>
    %cst_36 = arith.constant 0.000000e+00 : f32
    %110 = vector.broadcast %cst_36 : f32 to vector<1x20xf32>
    %111 = arith.maximumf %103, %110 : vector<1x20xf32>
    %cst_37 = arith.constant 0.000000e+00 : f32
    %112 = vector.broadcast %cst_37 : f32 to vector<20x1xf32>
    %113 = arith.maximumf %109, %112 : vector<20x1xf32>
    %114 = vector.extract_strided_slice %14 {offsets = [6, 0], sizes = [1, 20], strides = [1, 1]} : vector<8x20xf32> to vector<1x20xf32>
    %115 = vector.broadcast %113 : vector<20x1xf32> to vector<20x20xf32>
    %116 = arith.mulf %6, %115 : vector<20x20xf32>
    %cst_38 = arith.constant dense<0.000000e+00> : vector<20xf32>
    %117 = vector.multi_reduction <add>, %116, %cst_38 [0] : vector<20x20xf32> to vector<20xf32>
    %118 = vector.shape_cast %117 : vector<20xf32> to vector<1x20xf32>
    %119 = arith.addf %114, %118 : vector<1x20xf32>
    %120 = vector.extract_strided_slice %17 {offsets = [0, 6], sizes = [20, 1], strides = [1, 1]} : vector<20x8xf32> to vector<20x1xf32>
    %121 = vector.broadcast %111 : vector<1x20xf32> to vector<20x20xf32>
    %122 = arith.mulf %7, %121 : vector<20x20xf32>
    %cst_39 = arith.constant dense<0.000000e+00> : vector<20xf32>
    %123 = vector.multi_reduction <add>, %122, %cst_39 [1] : vector<20x20xf32> to vector<20xf32>
    %124 = vector.shape_cast %123 : vector<20xf32> to vector<20x1xf32>
    %125 = arith.addf %120, %124 : vector<20x1xf32>
    %cst_40 = arith.constant 0.000000e+00 : f32
    %126 = vector.broadcast %cst_40 : f32 to vector<1x20xf32>
    %127 = arith.maximumf %119, %126 : vector<1x20xf32>
    %cst_41 = arith.constant 0.000000e+00 : f32
    %128 = vector.broadcast %cst_41 : f32 to vector<20x1xf32>
    %129 = arith.maximumf %125, %128 : vector<20x1xf32>
    %130 = vector.extract_strided_slice %14 {offsets = [7, 0], sizes = [1, 20], strides = [1, 1]} : vector<8x20xf32> to vector<1x20xf32>
    %131 = vector.broadcast %129 : vector<20x1xf32> to vector<20x20xf32>
    %132 = arith.mulf %6, %131 : vector<20x20xf32>
    %cst_42 = arith.constant dense<0.000000e+00> : vector<20xf32>
    %133 = vector.multi_reduction <add>, %132, %cst_42 [0] : vector<20x20xf32> to vector<20xf32>
    %134 = vector.shape_cast %133 : vector<20xf32> to vector<1x20xf32>
    %135 = arith.addf %130, %134 : vector<1x20xf32>
    %cst_43 = arith.constant 0.000000e+00 : f32
    %136 = vector.broadcast %cst_43 : f32 to vector<1x20xf32>
    %137 = arith.maximumf %135, %136 : vector<1x20xf32>
    %138 = tpu.concatenate %31, %47, %63, %79, %95, %111, %127, %137 in 0 : vector<1x20xf32>, vector<1x20xf32>, vector<1x20xf32>, vector<1x20xf32>, vector<1x20xf32>, vector<1x20xf32>, vector<1x20xf32>, vector<1x20xf32> -> vector<8x20xf32>
    %cst_44 = arith.constant dense<0.000000e+00> : vector<8x128xf32>
    %139 = tpu.matmul %138, %10, %cst_44 {dimension_numbers = #tpu.dot_dimension_numbers<[1], [0], [0], [1], [0, 0, 1, 1], [], []>} : vector<8x20xf32>, vector<20x128xf32>, vector<8x128xf32> -> vector<8x128xf32>
    %140 = vector.broadcast %11 : vector<1x128xf32> to vector<8x128xf32>
    %141 = arith.addf %139, %140 : vector<8x128xf32>
    %c0_45 = arith.constant 0 : index
    %c0_46 = arith.constant 0 : index
    %142 = vector.load %arg2[%c0_45, %c0_46] : memref<8x128xf32, #tpu.memory_space<vmem>>, vector<8x128xf32>
    tpu.vector_store %arg2[%c0_45, %c0_46], %141 {strides = array<i32>} : memref<8x128xf32, #tpu.memory_space<vmem>>, vector<8x128xf32>,
    return
  }
}

</mosaic_0001>

<bundles_post_ra>
// kernel: rnn_forward.1
= control target key start
LH: loop header
LB: loop body
LE: loop exit
PB: predicated region body
PF: predicated region fallthrough
CT: control target
= control target key end

     0   :  { %vm45_vm0 = vcmask 1041408   ;;  %v801_v0 = vmov 0.0   ;;  %vm41_vm1 = vcmask 80896   ;;  %vm802_vm2 = vmmov 0   ;;  %s1100_s1 = inlined_call_operand.vmem [shape: f32[152,128], index: 1, kind: input, shape index: {}]   ;;  %s1101_s0 = inlined_call_operand.vmem [shape: f32[56,128], index: 0, kind: input, shape index: {}]   ;;  %s1102_s2 = inlined_call_operand.vmem [shape: f32[8,128], index: 2, kind: output, shape index: {}]  }
   0x1   :  { %751 = vmatprep.subr.mxu0 %v801_v0  ;;  %758 = vmatprep.subr.mxu1 %v801_v0  ;;  %v19_v1 = vld [vmem:[%s1100_s1 + $0x8] sm:$0x3]  ;;  %v13_v2 = vld [vmem:[%s1101_s0 + $0x10] sm:$0x3]  ;;  %v18_v3 = vld [vmem:[%s1100_s1] sm:$0xff]  ;;  %vm248_vm3 = vcmask 158720   ;;  %v311_v49 = vlaneseq }
   0x2   :  { %752 = vmatpush3.msk.msra.mxu0 %vm45_vm0, %v19_v1  ;;  %759 = vmatpush3.msk.msra.mxu1 %vm45_vm0, %v13_v2  ;;  %v12_v4 = vld [vmem:[%s1101_s0 + $0x8] sm:$0xff]  ;;  %v11_v5 = vld [vmem:[%s1101_s0] sm:$0xff]  ;;  %v20_v6 = vld [vmem:[%s1100_s1 + $0x10] sm:$0xff]  ;;  %vm244_vm4 = vcmask 162816   ;;  %v803_v15 = vmov 0   ;;  %vm630_vm5 = vcmask 1040384  }
   0x3   :  { %753 = vmatprep.subr.mxu0 %v801_v0  ;;  %760 = vmatprep.subr.mxu1 %v801_v0  ;;  %v735_v7 = vld [vmem:[%s1101_s0 + $0x18] ss:$0 sm:$0xff]  ;;  %v857_v8 = vld [vmem:[%s1100_s1 + $0x50] sm:$0xf]  ;;  %v865_v10 = vld [vmem:[%s1100_s1 + $0x40] sm:$0xff]  ;;  %v936_v53 = vshrl.u32 %v311_v49, 7 }
   0x4   :  { %754 = vmatpush3.msra.mxu0 %v18_v3  ;;  %755 = vmatprep.mubr.msk.f32.mxu0 %vm802_vm2, %v801_v0  ;;  %v264_v9 = vmul.f32 %v735_v7, %v857_v8  ;;  %v262_v11 = vmul.f32 %v735_v7, %v865_v10  ;;  %v873_v12 = vld [vmem:[%s1100_s1 + $0x48] sm:$0xff]  ;;  %v21_v13 = vld [vmem:[%s1100_s1 + $0x18] sm:$0xff]  ;;  %v22_v19 = vld [vmem:[%s1100_s1 + $0x20] sm:$0xf]  ;;  %vm633_vm6 = vcmask 1042432   ;;  %vm635_vm7 = vcmask 1043456  }
   0x5   :  { %761 = vmatpush3.msra.mxu1 %v12_v4  ;;  %762 = vmatprep.mubr.msk.f32.mxu1 %vm802_vm2, %v801_v0  ;;  %v263_v16 = vmul.f32 %v735_v7, %v873_v12  ;;  %v30_v20 = vld [vmem:[%s1100_s1 + $0x60] sm:$0xff]  ;;  %v32_v21 = vld [vmem:[%s1100_s1 + $0x70] sm:$0xf]  ;;  %v31_v23 = vld [vmem:[%s1100_s1 + $0x68] sm:$0xff]  ;;  %v313_v63 = vsub.s32 0, %v936_v53  ;;  %vm637_vm8 = vcmask 1044480  }
   0x6   :  { %756 = vmatmul.mubr.msk.f32.vlgmr.msra.gmra.mxu0 %vm41_vm1, %v11_v5  ;;  %763 = vmatmul.mubr.msk.f32.vlgmr.msra.gmra.mxu1 %vm41_vm1, %v20_v6  ;;  %v271_v14 = vsel %vm248_vm3, %v264_v9, 0.0  ;;  %v265_v17 = vsel %vm244_vm4, %v262_v11, 0.0  ;;  %v15_v22 = vld [vmem:[%s1101_s0 + $0x20] sm:$0xff]  ;;  %v16_v24 = vld [vmem:[%s1101_s0 + $0x28] sm:$0xff]  ;;  %v17_v25 = vld [vmem:[%s1101_s0 + $0x30] sm:$0xf] }
   0x7   :  { %765 = vmatprep.mubr.msk.f32.mxu1 %vm802_vm2, %v801_v0  ;;  %789 = vset.pattern.permute.xlu1 %v803_v15  ;;  %v268_v18 = vsel %vm244_vm4, %v263_v16, 0.0  ;;  %v915_v30 = vld [vmem:[%s1100_s1 + $0x28] sm:$0xff]  ;;  %v920_v31 = vld [vmem:[%s1100_s1 + $0x30] sm:$0xff]  ;;  %v927_v35 = vld [vmem:[%s1100_s1 + $0x38] sm:$0xf]  ;;  %vm639_vm9 = vcmask 1045504  }
   0x8   :  { %272 = vadd.xlane.f32.xlu1 %v271_v14  ;;  %790 = vset.pattern.permute.xlu0 %v803_v15  ;;  %v728_v51 = vld [vmem:[%s1100_s1 + $0x58] ss:$0 sm:$0xff]  ;;  %vm641_vm10 = vcmask 1046528  }
   0x9   :  { %266 = vadd.xlane.f32.xlu0 %v265_v17  ;;  %771 = vmatprep.subr.mxu0 %v801_v0 }
   0xa   :  { %766 = vmatmul.mubr.msk.f32.gmra.mxu1 %vm41_vm1, %v21_v13  ;;  %777 = vmatprep.mubr.msk.f32.mxu0 %vm802_vm2, %v801_v0 }
   0xb   :  { %768 = vmatprep.mubr.msk.f32.mxu1 %vm802_vm2, %v801_v0 }
   0xd   :  { %269 = vadd.xlane.f32.xlu0 %v268_v18 }
   0xe   :  { %769 = vmatmul.mubr.msk.f32.gmra.mxu1 %vm41_vm1, %v22_v19  ;;  %v804_v19 = vmov 1  }
  0x19   :  { %121 = vperm.xlu1 %789, %v30_v20  }
  0x1d   :  { %131 = vperm.xlu1 %789, %v32_v21  }
  0x21   :  { %228 = vperm.xlu1 %789, %v15_v22  }
  0x23   :  { %126 = vperm.xlu0 %790, %v31_v23  }
  0x25   :  { %233 = vperm.xlu1 %789, %v16_v24  }
  0x27   :  { %791 = vset.pattern.permute.xlu0 %v804_v19 }
  0x29   :  { %238 = vperm.xlu1 %789, %v17_v25  }
  0x91   :  { %v273_v26 = vpop.xlane.xlu1 %272 }
  0x92   :  { %v267_v47 = vpop.xlane.xlu0 %266 }
  0x95   :  { %v122_v27 = vpop.permute.xlu1 %121 }
  0x96   :  { %v270_v50 = vpop.xlane.xlu0 %269 }
  0x99   :  { %v132_v28 = vpop.permute.xlu1 %131 }
  0x9d   :  { %v229_v29 = vpop.permute.xlu1 %228 }
  0x9e   :  { %v241_v33 = vmul.f32 %v229_v29, %v915_v30  ;;  %v127_v58 = vpop.permute.xlu0 %126 }
  0xa0   :  { %v245_v37 = vsel %vm244_vm4, %v241_v33, 0.0 }
  0xa1   :  { %v234_v32 = vpop.permute.xlu1 %233 }
  0xa2   :  { %v242_v34 = vmul.f32 %v234_v32, %v920_v31 }
  0xa4   :  { %v246_v38 = vsel %vm244_vm4, %v242_v34, 0.0 }
  0xa5   :  { %v239_v36 = vpop.permute.xlu1 %238  ;;  %v247_v40 = vadd.f32 %v246_v38, %v245_v37 }
  0xa6   :  { %v243_v39 = vmul.f32 %v239_v36, %v927_v35 }
  0xa8   :  { %v249_v41 = vsel %vm248_vm3, %v243_v39, 0.0 }
  0xa9   :  { %v250_v42 = vadd.f32 %v249_v41, %v247_v40 }
  0xab   :  { %v251_v43 = vrot.slane %v250_v42, 4 }
  0xad   :  { %v252_v44 = vadd.f32 %v251_v43, %v250_v42  ;;  %v366_v43 = vsub.s32 1, %v936_v53 }
  0xaf   :  { %v253_v45 = vrot.slane %v252_v44, 2 }
  0xb1   :  { %v254_v46 = vadd.f32 %v253_v45, %v252_v44 }
  0xb3   :  { %v255_v48 = vrot.slane %v254_v46, 1 }
  0xb5   :  { %v256_v52 = vadd.f32 %v255_v48, %v254_v46 }
  0xc6   :  { %v115_v54 = vpop.f32.mrf.mxu0  ;;  %v212_v55 = vpop.f32.mrf.mxu1 }
  0xc7   :  { %v938_v56 = vadd.f32 %v728_v51, %v115_v54  ;;  %v940_v57 = vadd.f32 %v212_v55, %v122_v27 }
  0xc8   :  { %v764_v59 = vpop.f32.mrf.mxu1  ;;  %v757_v60 = vpop.f32.mrf.mxu0 }
  0xc9   :  { %v274_v61 = vadd.f32 %v267_v47, %v940_v57  ;;  %v944_v62 = vadd.f32 %v256_v52, %v938_v56 }
  0xca   :  { %v217_v1 = vpop.f32.mrf.mxu1 }
  0xcb   :  { %v947_v2 = vadd.f32 %v217_v1, %v127_v58  ;;  %v278_v3 = vmax.f32 %v274_v61, 0.0  ;;  %v277_v4 = vmax.f32 %v944_v62, 0.0 }
  0xcc   :  { %v767_v5 = vpop.f32.mrf.mxu1 }
  0xcd   :  { %283 = vperm.xlu1 %789, %v278_v3   ;;  %v275_v6 = vadd.f32 %v270_v50, %v947_v2  ;;  %v314_v7 = vrot.slane %v277_v4, %v313_v63 }
  0xce   :  { %v222_v9 = vpop.f32.mrf.mxu1 }
  0xcf   :  { %v953_v11 = vadd.f32 %v222_v9, %v132_v28  ;;  %v279_v13 = vmax.f32 %v275_v6, 0.0  ;;  %v316_v14 = vmul.f32 %v314_v7, %v873_v12  ;;  %v315_v20 = vmul.f32 %v314_v7, %v865_v10 }
  0xd0   :  { %v770_v15 = vpop.f32.mrf.mxu1  ;;  %v317_v50 = vmul.f32 %v314_v7, %v857_v8 }
  0xd1   :  { %288 = vperm.xlu1 %789, %v279_v13   ;;  %v321_v16 = vsel %vm244_vm4, %v316_v14, 0.0  ;;  %v276_v17 = vadd.f32 %v273_v26, %v953_v11  ;;  %v318_v21 = vsel %vm244_vm4, %v315_v20, 0.0 }
  0xd2   :  { %322 = vadd.xlane.f32.xlu0 %v321_v16  ;;  %v324_v52 = vsel %vm248_vm3, %v317_v50, 0.0  ;;  %v805_v16 = vmov 2  }
  0xd3   :  { %v280_v18 = vmax.f32 %v276_v17, 0.0 }
  0xd5   :  { %293 = vperm.xlu1 %789, %v280_v18  }
  0xd9   :  { %792 = vset.pattern.permute.xlu1 %v804_v19 }
  0xf9   :  { %319 = vadd.xlane.f32.xlu1 %v318_v21 }
 0x148   :  { %v284_v22 = vpop.permute.xlu1 %283 }
 0x149   :  { %v296_v24 = vmul.f32 %v284_v22, %v915_v30 }
 0x14b   :  { %v299_v28 = vsel %vm244_vm4, %v296_v24, 0.0 }
 0x14c   :  { %v289_v23 = vpop.permute.xlu1 %288 }
 0x14d   :  { %v297_v25 = vmul.f32 %v289_v23, %v920_v31 }
 0x14f   :  { %v300_v27 = vsel %vm244_vm4, %v297_v25, 0.0 }
 0x150   :  { %v294_v26 = vpop.permute.xlu1 %293  ;;  %v301_v32 = vadd.f32 %v300_v27, %v299_v28 }
 0x151   :  { %v298_v29 = vmul.f32 %v294_v26, %v927_v35 }
 0x153   :  { %v302_v33 = vsel %vm248_vm3, %v298_v29, 0.0 }
 0x154   :  { %v303_v34 = vadd.f32 %v302_v33, %v301_v32 }
 0x156   :  { %v304_v36 = vrot.slane %v303_v34, 4 }
 0x158   :  { %v305_v37 = vadd.f32 %v304_v36, %v303_v34 }
 0x15a   :  { %v306_v38 = vrot.slane %v305_v37, 2 }
 0x15b   :  { %v323_v55 = vpop.xlane.xlu0 %322 }
 0x15c   :  { %v307_v39 = vadd.f32 %v306_v38, %v305_v37  ;;  %v328_v58 = vadd.f32 %v323_v55, %v947_v2  ;;  %v419_v55 = vsub.s32 2, %v936_v53 }
 0x15e   :  { %v308_v40 = vrot.slane %v307_v39, 1  ;;  %v332_v59 = vmax.f32 %v328_v58, 0.0 }
 0x160   :  { %v309_v41 = vadd.f32 %v308_v40, %v307_v39 }
 0x162   :  { %v967_v42 = vadd.f32 %v309_v41, %v938_v56 }
 0x164   :  { %v330_v44 = vmax.f32 %v967_v42, 0.0 }
 0x166   :  { %v367_v45 = vrot.slane %v330_v44, %v366_v43 }
 0x168   :  { %v368_v46 = vmul.f32 %v367_v45, %v865_v10  ;;  %v369_v47 = vmul.f32 %v367_v45, %v873_v12  ;;  %v370_v51 = vmul.f32 %v367_v45, %v857_v8 }
 0x16a   :  { %v371_v48 = vsel %vm244_vm4, %v368_v46, 0.0  ;;  %v374_v49 = vsel %vm244_vm4, %v369_v47, 0.0  ;;  %v377_v54 = vsel %vm248_vm3, %v370_v51, 0.0 }
 0x16b   :  { %372 = vadd.xlane.f32.xlu0 %v371_v48  ;;  %375 = vadd.xlane.f32.xlu1 %v374_v49 }
 0x16f   :  { %325 = vadd.xlane.f32.xlu0 %v324_v52  ;;  %378 = vadd.xlane.f32.xlu1 %v377_v54 }
 0x180   :  { %341 = vperm.xlu1 %792, %v332_v59  }
 0x182   :  { %v320_v60 = vpop.xlane.xlu1 %319 }
 0x183   :  { %v327_v61 = vadd.f32 %v320_v60, %v940_v57  ;;  %v631_v60 = vsel %vm630_vm5, %v277_v4, %v330_v44  ;;  %v472_v4 = vsub.s32 3, %v936_v53 }
 0x185   :  { %v331_v63 = vmax.f32 %v327_v61, 0.0 }
 0x187   :  { %336 = vperm.xlu0 %791, %v331_v63  }
 0x1f4   :  { %v373_v1 = vpop.xlane.xlu0 %372  ;;  %v376_v6 = vpop.xlane.xlu1 %375 }
 0x1f5   :  { %v380_v9 = vadd.f32 %v373_v1, %v940_v57  ;;  %v381_v14 = vadd.f32 %v376_v6, %v947_v2 }
 0x1f7   :  { %v384_v13 = vmax.f32 %v380_v9, 0.0  ;;  %v385_v17 = vmax.f32 %v381_v14, 0.0 }
 0x1f8   :  { %v326_v3 = vpop.xlane.xlu0 %325  ;;  %v379_v15 = vpop.xlane.xlu1 %378 }
 0x1f9   :  { %v329_v5 = vadd.f32 %v326_v3, %v953_v11  ;;  %v382_v18 = vadd.f32 %v379_v15, %v953_v11 }
 0x1fb   :  { %v333_v7 = vmax.f32 %v329_v5, 0.0  ;;  %v386_v19 = vmax.f32 %v382_v18, 0.0 }
 0x1fc   :  { %v342_v21 = vpop.permute.xlu1 %341 }
 0x1fd   :  { %346 = vperm.xlu1 %792, %v333_v7   ;;  %v350_v23 = vmul.f32 %v342_v21, %v920_v31 }
 0x1ff   :  { %v353_v27 = vsel %vm244_vm4, %v350_v23, 0.0  ;;  %v806_v23 = vmov 3  }
 0x200   :  { %795 = vset.pattern.permute.xlu0 %v806_v23 }
 0x201   :  { %793 = vset.pattern.permute.xlu1 %v805_v16 }
 0x202   :  { %389 = vperm.xlu1 %793, %v384_v13   ;;  %v337_v20 = vpop.permute.xlu0 %336 }
 0x203   :  { %v349_v22 = vmul.f32 %v337_v20, %v915_v30 }
 0x205   :  { %v352_v24 = vsel %vm244_vm4, %v349_v22, 0.0 }
 0x206   :  { %394 = vperm.xlu1 %793, %v385_v17   ;;  %v354_v28 = vadd.f32 %v353_v27, %v352_v24 }
 0x20a   :  { %399 = vperm.xlu1 %793, %v386_v19  }
 0x20e   :  { %794 = vset.pattern.permute.xlu1 %v806_v23  ;;  %v525_v23 = vsub.s32 4, %v936_v53 }
 0x278   :  { %v347_v25 = vpop.permute.xlu1 %346 }
 0x279   :  { %v351_v26 = vmul.f32 %v347_v25, %v927_v35 }
 0x27b   :  { %v355_v29 = vsel %vm248_vm3, %v351_v26, 0.0 }
 0x27c   :  { %v356_v32 = vadd.f32 %v355_v29, %v354_v28 }
 0x27d   :  { %v390_v33 = vpop.permute.xlu1 %389 }
 0x27e   :  { %v357_v34 = vrot.slane %v356_v32, 4  ;;  %v402_v39 = vmul.f32 %v390_v33, %v915_v30 }
 0x280   :  { %v358_v36 = vadd.f32 %v357_v34, %v356_v32  ;;  %v405_v47 = vsel %vm244_vm4, %v402_v39, 0.0 }
 0x281   :  { %v395_v37 = vpop.permute.xlu1 %394 }
 0x282   :  { %v359_v38 = vrot.slane %v358_v36, 2  ;;  %v403_v40 = vmul.f32 %v395_v37, %v920_v31 }
 0x284   :  { %v360_v41 = vadd.f32 %v359_v38, %v358_v36  ;;  %v406_v43 = vsel %vm244_vm4, %v403_v40, 0.0 }
 0x285   :  { %v400_v45 = vpop.permute.xlu1 %399  ;;  %v407_v49 = vadd.f32 %v406_v43, %v405_v47 }
 0x286   :  { %v361_v46 = vrot.slane %v360_v41, 1  ;;  %v404_v48 = vmul.f32 %v400_v45, %v927_v35 }
 0x288   :  { %v362_v50 = vadd.f32 %v361_v46, %v360_v41  ;;  %v408_v51 = vsel %vm248_vm3, %v404_v48, 0.0  ;;  %v807_v46 = vmov 4  }
 0x289   :  { %v409_v52 = vadd.f32 %v408_v51, %v407_v49 }
 0x28a   :  { %v363_v54 = vadd.f32 %v362_v50, %v938_v56 }
 0x28b   :  { %v410_v58 = vrot.slane %v409_v52, 4 }
 0x28c   :  { %v383_v59 = vmax.f32 %v363_v54, 0.0 }
 0x28d   :  { %v411_v61 = vadd.f32 %v410_v58, %v409_v52 }
 0x28e   :  { %v420_v63 = vrot.slane %v383_v59, %v419_v55  ;;  %v632_v1 = vsel %vm45_vm0, %v631_v60, %v383_v59 }
 0x28f   :  { %v412_v3 = vrot.slane %v411_v61, 2 }
 0x290   :  { %v422_v5 = vmul.f32 %v420_v63, %v873_v12  ;;  %v421_v6 = vmul.f32 %v420_v63, %v865_v10  ;;  %v423_v19 = vmul.f32 %v420_v63, %v857_v8 }
 0x291   :  { %v413_v7 = vadd.f32 %v412_v3, %v411_v61 }
 0x292   :  { %v427_v9 = vsel %vm244_vm4, %v422_v5, 0.0  ;;  %v424_v13 = vsel %vm244_vm4, %v421_v6, 0.0  ;;  %v430_v25 = vsel %vm248_vm3, %v423_v19, 0.0 }
 0x293   :  { %v414_v14 = vrot.slane %v413_v7, 1  ;;  %428 = vadd.xlane.f32.xlu0 %v427_v9  ;;  %425 = vadd.xlane.f32.xlu1 %v424_v13 }
 0x295   :  { %v415_v42 = vadd.f32 %v414_v14, %v413_v7 }
 0x297   :  { %v416_v62 = vadd.f32 %v415_v42, %v938_v56 }
 0x299   :  { %v436_v44 = vmax.f32 %v416_v62, 0.0 }
 0x29b   :  { %v473_v15 = vrot.slane %v436_v44, %v472_v4  ;;  %v1012_v16 = vsel %vm633_vm6, %v632_v1, %v436_v44 }
 0x29d   :  { %v475_v17 = vmul.f32 %v473_v15, %v873_v12  ;;  %v474_v18 = vmul.f32 %v473_v15, %v865_v10  ;;  %v476_v22 = vmul.f32 %v473_v15, %v857_v8 }
 0x29f   :  { %v480_v20 = vsel %vm244_vm4, %v475_v17, 0.0  ;;  %v477_v21 = vsel %vm244_vm4, %v474_v18, 0.0  ;;  %v483_v24 = vsel %vm248_vm3, %v476_v22, 0.0 }
 0x2a0   :  { %481 = vadd.xlane.f32.xlu0 %v480_v20  ;;  %478 = vadd.xlane.f32.xlu1 %v477_v21 }
 0x2a4   :  { %484 = vadd.xlane.f32.xlu0 %v483_v24  ;;  %431 = vadd.xlane.f32.xlu1 %v430_v25 }
 0x31c   :  { %v429_v27 = vpop.xlane.xlu0 %428  ;;  %v426_v26 = vpop.xlane.xlu1 %425 }
 0x31d   :  { %v434_v28 = vadd.f32 %v429_v27, %v947_v2  ;;  %v433_v29 = vadd.f32 %v426_v26, %v940_v57 }
 0x31f   :  { %v438_v32 = vmax.f32 %v434_v28, 0.0  ;;  %v437_v33 = vmax.f32 %v433_v29, 0.0 }
 0x321   :  { %447 = vperm.xlu0 %795, %v438_v32   ;;  %442 = vperm.xlu1 %794, %v437_v33  }
 0x329   :  { %v479_v34 = vpop.xlane.xlu1 %478  ;;  %v482_v38 = vpop.xlane.xlu0 %481 }
 0x32a   :  { %v486_v40 = vadd.f32 %v479_v34, %v940_v57  ;;  %v487_v41 = vadd.f32 %v482_v38, %v947_v2 }
 0x32c   :  { %v490_v43 = vmax.f32 %v486_v40, 0.0  ;;  %v491_v47 = vmax.f32 %v487_v41, 0.0  ;;  %v578_v41 = vsub.s32 5, %v936_v53 }
 0x32d   :  { %v432_v36 = vpop.xlane.xlu1 %431  ;;  %v485_v45 = vpop.xlane.xlu0 %484 }
 0x32e   :  { %v435_v37 = vadd.f32 %v432_v36, %v953_v11  ;;  %v488_v48 = vadd.f32 %v485_v45, %v953_v11 }
 0x330   :  { %v439_v39 = vmax.f32 %v435_v37, 0.0  ;;  %v492_v49 = vmax.f32 %v488_v48, 0.0 }
 0x332   :  { %452 = vperm.xlu1 %794, %v439_v39  }
 0x336   :  { %796 = vset.pattern.permute.xlu1 %v807_v46 }
 0x337   :  { %495 = vperm.xlu1 %796, %v490_v43  }
 0x33b   :  { %500 = vperm.xlu1 %796, %v491_v47  }
 0x33f   :  { %505 = vperm.xlu1 %796, %v492_v49  }
 0x39c   :  { %v448_v50 = vpop.permute.xlu0 %447  ;;  %v443_v51 = vpop.permute.xlu1 %442 }
 0x39d   :  { %v456_v52 = vmul.f32 %v448_v50, %v920_v31  ;;  %v455_v54 = vmul.f32 %v443_v51, %v915_v30  ;;  %v808_v51 = vmov 5  }
 0x39e   :  { %798 = vset.pattern.permute.xlu0 %v808_v51  ;;  %797 = vset.pattern.permute.xlu1 %v808_v51 }
 0x39f   :  { %v459_v55 = vsel %vm244_vm4, %v456_v52, 0.0  ;;  %v458_v58 = vsel %vm244_vm4, %v455_v54, 0.0 }
 0x3a0   :  { %v460_v61 = vadd.f32 %v459_v55, %v458_v58 }
 0x3ad   :  { %v453_v59 = vpop.permute.xlu1 %452 }
 0x3ae   :  { %v457_v60 = vmul.f32 %v453_v59, %v927_v35 }
 0x3b0   :  { %v461_v63 = vsel %vm248_vm3, %v457_v60, 0.0 }
 0x3b1   :  { %v462_v1 = vadd.f32 %v461_v63, %v460_v61  ;;  %v809_v61 = vmov 6  }
 0x3b2   :  { %v496_v3 = vpop.permute.xlu1 %495 }
 0x3b3   :  { %v463_v5 = vrot.slane %v462_v1, 4  ;;  %v508_v13 = vmul.f32 %v496_v3, %v915_v30 }
 0x3b5   :  { %v464_v6 = vadd.f32 %v463_v5, %v462_v1  ;;  %v511_v15 = vsel %vm244_vm4, %v508_v13, 0.0 }
 0x3b6   :  { %v501_v7 = vpop.permute.xlu1 %500 }
 0x3b7   :  { %v465_v9 = vrot.slane %v464_v6, 2  ;;  %v509_v14 = vmul.f32 %v501_v7, %v920_v31 }
 0x3b9   :  { %v466_v42 = vadd.f32 %v465_v9, %v464_v6  ;;  %v512_v62 = vsel %vm244_vm4, %v509_v14, 0.0 }
 0x3ba   :  { %v506_v4 = vpop.permute.xlu1 %505  ;;  %v513_v18 = vadd.f32 %v512_v62, %v511_v15 }
 0x3bb   :  { %v467_v44 = vrot.slane %v466_v42, 1  ;;  %v510_v17 = vmul.f32 %v506_v4, %v927_v35  ;;  %v35_v4 = vld [vmem:[%s1100_s1 + $0x88] sm:$0xf] }
 0x3bc   :  { %772 = vmatpush3.msk.msra.mxu0 %vm635_vm7, %v35_v4 }
 0x3bd   :  { %v468_v19 = vadd.f32 %v467_v44, %v466_v42  ;;  %v514_v20 = vsel %vm248_vm3, %v510_v17, 0.0  ;;  %773 = vmatprep.subr.mxu0 %v801_v0 }
 0x3be   :  { %v515_v21 = vadd.f32 %v514_v20, %v513_v18 }
 0x3bf   :  { %v469_v22 = vadd.f32 %v468_v19, %v938_v56 }
 0x3c0   :  { %v516_v24 = vrot.slane %v515_v21, 4 }
 0x3c1   :  { %v489_v25 = vmax.f32 %v469_v22, 0.0 }
 0x3c2   :  { %v517_v27 = vadd.f32 %v516_v24, %v515_v21 }
 0x3c3   :  { %v526_v26 = vrot.slane %v489_v25, %v525_v23  ;;  %v636_v28 = vsel %vm635_vm7, %v1012_v16, %v489_v25 }
 0x3c4   :  { %v518_v29 = vrot.slane %v517_v27, 2 }
 0x3c5   :  { %v528_v32 = vmul.f32 %v526_v26, %v873_v12  ;;  %v527_v33 = vmul.f32 %v526_v26, %v865_v10  ;;  %v529_v52 = vmul.f32 %v526_v26, %v857_v8 }
 0x3c6   :  { %v519_v34 = vadd.f32 %v518_v29, %v517_v27 }
 0x3c7   :  { %v533_v36 = vsel %vm244_vm4, %v528_v32, 0.0  ;;  %v530_v37 = vsel %vm244_vm4, %v527_v33, 0.0  ;;  %v536_v54 = vsel %vm248_vm3, %v529_v52, 0.0 }
 0x3c8   :  { %v520_v38 = vrot.slane %v519_v34, 1  ;;  %534 = vadd.xlane.f32.xlu0 %v533_v36  ;;  %531 = vadd.xlane.f32.xlu1 %v530_v37 }
 0x3ca   :  { %v521_v39 = vadd.f32 %v520_v38, %v519_v34 }
 0x3cc   :  { %v522_v40 = vadd.f32 %v521_v39, %v938_v56 }
 0x3ce   :  { %v542_v16 = vmax.f32 %v522_v40, 0.0 }
 0x3d0   :  { %v579_v43 = vrot.slane %v542_v16, %v578_v41  ;;  %v1050_v45 = vsel %vm637_vm8, %v636_v28, %v542_v16 }
 0x3d2   :  { %v582_v46 = vmul.f32 %v579_v43, %v857_v8  ;;  %v580_v47 = vmul.f32 %v579_v43, %v865_v10  ;;  %v581_v50 = vmul.f32 %v579_v43, %v873_v12 }
 0x3d4   :  { %v589_v48 = vsel %vm248_vm3, %v582_v46, 0.0  ;;  %v583_v49 = vsel %vm244_vm4, %v580_v47, 0.0  ;;  %v586_v53 = vsel %vm244_vm4, %v581_v50, 0.0 }
 0x3d5   :  { %590 = vadd.xlane.f32.xlu0 %v589_v48  ;;  %584 = vadd.xlane.f32.xlu1 %v583_v49 }
 0x3d9   :  { %587 = vadd.xlane.f32.xlu1 %v586_v53 }
 0x3dd   :  { %537 = vadd.xlane.f32.xlu1 %v536_v54 }
 0x451   :  { %v535_v10 = vpop.xlane.xlu0 %534  ;;  %v532_v55 = vpop.xlane.xlu1 %531 }
 0x452   :  { %v540_v58 = vadd.f32 %v535_v10, %v947_v2  ;;  %v539_v59 = vadd.f32 %v532_v55, %v940_v57  ;;  %v736_v10 = vld [vmem:[%s1100_s1 + $0x90] ss:$0 sm:$0xff] }
 0x454   :  { %v544_v12 = vmax.f32 %v540_v58, 0.0  ;;  %v543_v60 = vmax.f32 %v539_v59, 0.0 }
 0x456   :  { %553 = vperm.xlu0 %798, %v544_v12   ;;  %548 = vperm.xlu1 %797, %v543_v60  }
 0x45a   :  { %800 = vset.pattern.permute.xlu0 %v809_v61 }
 0x45e   :  { %v585_v63 = vpop.xlane.xlu1 %584  ;;  %v591_v13 = vpop.xlane.xlu0 %590 }
 0x45f   :  { %v592_v6 = vadd.f32 %v585_v63, %v940_v57  ;;  %v594_v14 = vadd.f32 %v591_v13, %v953_v11  ;;  %v34_v57 = vld [vmem:[%s1100_s1 + $0x80] sm:$0xff] }
 0x460   :  { %774 = vmatpush3.msra.mxu0 %v34_v57 }
 0x461   :  { %v596_v7 = vmax.f32 %v592_v6, 0.0  ;;  %v598_v62 = vmax.f32 %v594_v14, 0.0  ;;  %775 = vmatprep.subr.mxu0 %v801_v0 }
 0x462   :  { %v588_v1 = vpop.xlane.xlu1 %587 }
 0x463   :  { %v593_v9 = vadd.f32 %v588_v1, %v947_v2  ;;  %v33_v2 = vld [vmem:[%s1100_s1 + $0x78] sm:$0xff] }
 0x464   :  { %776 = vmatpush3.msra.mxu0 %v33_v2 }
 0x465   :  { %v597_v42 = vmax.f32 %v593_v9, 0.0 }
 0x466   :  { %v538_v3 = vpop.xlane.xlu1 %537 }
 0x467   :  { %v541_v8 = vadd.f32 %v538_v3, %v953_v11 }
 0x469   :  { %v545_v5 = vmax.f32 %v541_v8, 0.0 }
 0x46b   :  { %558 = vperm.xlu1 %797, %v545_v5  }
 0x46f   :  { %799 = vset.pattern.permute.xlu1 %v809_v61 }
 0x470   :  { %601 = vperm.xlu1 %799, %v596_v7  }
 0x474   :  { %606 = vperm.xlu1 %799, %v597_v42  }
 0x478   :  { %611 = vperm.xlu1 %799, %v598_v62  }
 0x4d1   :  { %v554_v11 = vpop.permute.xlu0 %553  ;;  %v549_v44 = vpop.permute.xlu1 %548 }
 0x4d2   :  { %v562_v15 = vmul.f32 %v554_v11, %v920_v31  ;;  %v561_v17 = vmul.f32 %v549_v44, %v915_v30 }
 0x4d4   :  { %v565_v18 = vsel %vm244_vm4, %v562_v15, 0.0  ;;  %v564_v19 = vsel %vm244_vm4, %v561_v17, 0.0 }
 0x4d5   :  { %v566_v22 = vadd.f32 %v565_v18, %v564_v19 }
 0x4e6   :  { %v559_v20 = vpop.permute.xlu1 %558 }
 0x4e7   :  { %v563_v21 = vmul.f32 %v559_v20, %v927_v35 }
 0x4e9   :  { %v567_v23 = vsel %vm248_vm3, %v563_v21, 0.0 }
 0x4ea   :  { %v568_v24 = vadd.f32 %v567_v23, %v566_v22 }
 0x4eb   :  { %v602_v25 = vpop.permute.xlu1 %601 }
 0x4ec   :  { %v569_v0 = vrot.slane %v568_v24, 4  ;;  %v614_v29 = vmul.f32 %v602_v25, %v915_v30 }
 0x4ee   :  { %v570_v27 = vadd.f32 %v569_v0, %v568_v24  ;;  %v617_v37 = vsel %vm244_vm4, %v614_v29, 0.0 }
 0x4ef   :  { %v607_v26 = vpop.permute.xlu1 %606 }
 0x4f0   :  { %v571_v28 = vrot.slane %v570_v27, 2  ;;  %v615_v32 = vmul.f32 %v607_v26, %v920_v31 }
 0x4f2   :  { %v618_v33 = vsel %vm244_vm4, %v615_v32, 0.0  ;;  %v572_v36 = vadd.f32 %v571_v28, %v570_v27 }
 0x4f3   :  { %v612_v34 = vpop.permute.xlu1 %611  ;;  %v619_v39 = vadd.f32 %v618_v33, %v617_v37 }
 0x4f4   :  { %v616_v38 = vmul.f32 %v612_v34, %v927_v35  ;;  %v573_v16 = vrot.slane %v572_v36, 1 }
 0x4f6   :  { %v620_v40 = vsel %vm248_vm3, %v616_v38, 0.0  ;;  %v574_v47 = vadd.f32 %v573_v16, %v572_v36 }
 0x4f7   :  { %v621_v41 = vadd.f32 %v620_v40, %v619_v39 }
 0x4f8   :  { %v575_v31 = vadd.f32 %v574_v47, %v938_v56 }
 0x4f9   :  { %v622_v43 = vrot.slane %v621_v41, 4 }
 0x4fa   :  { %v595_v51 = vmax.f32 %v575_v31, 0.0 }
 0x4fb   :  { %v623_v46 = vadd.f32 %v622_v43, %v621_v41 }
 0x4fc   :  { %v640_v52 = vsel %vm639_vm9, %v1050_v45, %v595_v51 }
 0x4fd   :  { %v624_v48 = vrot.slane %v623_v46, 2 }
 0x4ff   :  { %v625_v30 = vadd.f32 %v624_v48, %v623_v46 }
 0x501   :  { %v626_v49 = vrot.slane %v625_v30, 1 }
 0x503   :  { %v627_v50 = vadd.f32 %v626_v49, %v625_v30 }
 0x505   :  { %v628_v53 = vadd.f32 %v627_v50, %v938_v56 }
 0x507   :  { %v629_v35 = vmax.f32 %v628_v53, 0.0 }
 0x509   :  { %v642_v54 = vsel %vm641_vm10, %v640_v52, %v629_v35 }
 0x50a   :  { %778 = vmatmul.mubr.msk.f32.vlgmr.msra.gmra.mxu0 %vm244_vm4, %v642_v54 }
 0x5ca   :  { %v719_v55 = vpop.f32.mrf.mxu0 }
 0x5cb   :  { %v720_v58 = vadd.f32 %v736_v10, %v719_v55 }
 0x5cc   :  { %v779_v59 = vpop.f32.mrf.mxu0 }
 0x5cd   :  { %723 = vst [vmem:[%s1102_s2] sm:$0xff] %v720_v58 }

</bundles_post_ra>
